<compile_context>
chip_gen: v6e
topology: v6e:2x2x1
jax: 0.10.0
libtpu: 0.0.40
codegen_flags: <defaults>
</compile_context>

<pallas_src>
import functools
import math

import jax
import jax.numpy as jnp
from jax.experimental import pallas as pl
from jax.experimental.pallas import tpu as pltpu

_TWO_PI = 2.0 * math.pi


def _round_up(n, m):
    return ((n + m - 1) // m) * m


def _gfp_kernel(x_ref, w_ref, o_ref, *, batch_tile):
    # x_ref: (B_pad, 1)       timesteps, resident in VMEM; sliced per grid step
    # w_ref: (1, HALF_PAD)    frozen Gaussian frequencies, resident
    # o_ref: (TB, 2*HALF_PAD) [ sin(x*W*2pi) | cos(x*W*2pi) ], lane-aligned halves
    half = w_ref.shape[1]
    i = pl.program_id(0)
    row0 = pl.multiple_of(i * batch_tile, batch_tile)
    x = x_ref[pl.ds(row0, batch_tile), :].astype(jnp.float32)          # (TB, 1)
    # Scale w by 2*pi in-kernel (one 1xHALF VPU mul per step — negligible).
    # Do NOT hoist into a pl.when(program_id==0) scratch: with the batch axis
    # marked "parallel" the grid is sharded across TensorCores and only one core
    # would ever execute step 0, leaving the other core's scratch uninitialized.
    w = w_ref[...].astype(jnp.float32) * _TWO_PI                        # (1, HALF)
    proj = x * w                                                        # (TB, HALF) f32
    # sin/cos in f32 (no bf16 VPU on v5e); cast only at the (lane-dense) store.
    o_ref[:, :half] = jnp.sin(proj).astype(o_ref.dtype)
    o_ref[:, half:] = jnp.cos(proj).astype(o_ref.dtype)


def _default_batch_tile(B, embed_dim_pad, out_dtype):
    """Largest safe tile: amortize per-step overhead, stay inside VMEM budget."""
    out_bytes = jnp.dtype(out_dtype).itemsize
    # ~ double-buffered output tile + f32 proj intermediate, per row of the tile.
    per_row = 2 * embed_dim_pad * out_bytes + (embed_dim_pad // 2) * 4
    budget = 8 << 20  # conservative on every generation (incl. v7x 64 MiB VMEM)
    tile = 1024
    while tile > 16 and tile * per_row > budget:
        tile //= 2
    b16 = _round_up(max(B, 1), 16)
    if b16 <= tile:
        tile = b16                                   # single step; don't over-pad
    elif b16 < 2 * tile:
        tile = _round_up((b16 + 1) // 2, 16)         # >=2 steps -> both v7x TCs busy
    return tile


def gaussian_fourier_projection(x, w, *, batch_tile=None, out_dtype=None):
    """JAX/Pallas equivalent of GaussianFourierProjection.forward.

    x : (B,)     time steps
    w : (half,)  frozen random frequencies (randn(embed_dim//2) * scale)
    returns (B, 2*half) = concat([sin(x*W*2pi), cos(x*W*2pi)], axis=-1)
    """
    B = x.shape[0]
    half = w.shape[0]
    out_dtype = jnp.dtype(out_dtype) if out_dtype is not None else x.dtype

    # Lane-align the frequency axis (unmasked vst on both output halves) and
    # sublane-align the batch axis (>=16 rows: sub-f32 min tile + packing).
    half_pad = _round_up(half, 128)
    embed_pad = 2 * half_pad
    if batch_tile is None:
        batch_tile = _default_batch_tile(B, embed_pad, out_dtype)
    assert batch_tile % 16 == 0, "batch_tile must be a multiple of 16"
    B_pad = _round_up(B, batch_tile)

    x2 = x.reshape(B, 1)          # no wrapper-side casts; the kernel casts to f32
    w2 = w.reshape(1, half)
    if B_pad != B:
        x2 = jnp.pad(x2, ((0, B_pad - B), (0, 0)))
    if half_pad != half:
        w2 = jnp.pad(w2, ((0, 0), (0, half_pad - half)))

    out = pl.pallas_call(
        functools.partial(_gfp_kernel, batch_tile=batch_tile),
        out_shape=jax.ShapeDtypeStruct((B_pad, embed_pad), out_dtype),
        grid_spec=pltpu.PrefetchScalarGridSpec(
            num_scalar_prefetch=0,
            grid=(B_pad // batch_tile,),
            in_specs=[
                pl.BlockSpec((B_pad, 1), lambda i: (0, 0)),      # x fully resident
                pl.BlockSpec((1, half_pad), lambda i: (0, 0)),   # w resident
            ],
            out_specs=pl.BlockSpec((batch_tile, embed_pad), lambda i: (i, 0)),
        ),
        compiler_params=pltpu.CompilerParams(
            dimension_semantics=("parallel",)),
    )(x2, w2)

    if half_pad == half:
        return out if B_pad == B else out[:B]
    # Un-pad: sin lives in [:, :half], cos in [:, half_pad:half_pad+half].
    return jnp.concatenate(
        [out[:B, :half], out[:B, half_pad:half_pad + half]], axis=-1)


def _reference_forward(x, w):
    """Pure-JAX reference matching the PyTorch module."""
    x_proj = x[:, None] * w[None, :] * _TWO_PI
    return jnp.concatenate([jnp.sin(x_proj), jnp.cos(x_proj)], axis=-1)


if __name__ == "__main__":
    key = jax.random.PRNGKey(0)
    k_w, k_x = jax.random.split(key)

    # Small, module-consistent shapes: embed_dim=256 -> half=128 (lane-aligned).
    embed_dim = 256
    half = embed_dim // 2
    scale = 30.0
    B = 8

    w = jax.random.normal(k_w, (half,), dtype=jnp.float32) * scale
    x = jax.random.uniform(k_x, (B,), dtype=jnp.float32)

    ref = jax.block_until_ready(_reference_forward(x, w))

    # f32 output, aligned fast path.
    out = jax.block_until_ready(gaussian_fourier_projection(x, w))
    assert out.shape == (B, embed_dim)
    # scale=30 makes |x*W*2pi| up to a few hundred; f32 sin/cos range reduction
    # can differ slightly between lowerings, so use a modest tolerance.
    # TODO(synk): if bit-accuracy vs PyTorch matters, do an explicit mod-2pi
    # reduction on x*W before the 2*pi scale and sin/cos.
    assert jnp.allclose(out, ref, atol=1e-3, rtol=1e-3)

    # bf16 output: halves HBM writeback bytes (the roofline at large B).
    out_bf16 = jax.block_until_ready(
        gaussian_fourier_projection(x, w, out_dtype=jnp.bfloat16))
    assert out_bf16.shape == (B, embed_dim) and out_bf16.dtype == jnp.bfloat16
    assert jnp.allclose(out_bf16.astype(jnp.float32), ref, atol=2e-2, rtol=2e-2)

    # Robustness path: batch not a multiple of the tile AND half not a multiple
    # of 128 (kernel computes on padded shapes, wrapper strips the padding).
    B2, half2 = 6, 96
    w_u = jax.random.normal(k_w, (half2,), dtype=jnp.float32) * scale
    x_u = jax.random.uniform(k_x, (B2,), dtype=jnp.float32)
    out_u = jax.block_until_ready(gaussian_fourier_projection(x_u, w_u))
    ref_u = _reference_forward(x_u, w_u)
    assert out_u.shape == (B2, 2 * half2)
    assert jnp.allclose(out_u, ref_u, atol=1e-3, rtol=1e-3)

    print("KERNEL_OK")
</pallas_src>

<mosaic_0001>
module attributes {stable_mosaic.version = 11 : i64} {
  func.func @_gfp_kernel(%arg0: i32, %arg1: memref<16x1xf32, #tpu.memory_space<vmem>>, %arg2: memref<1x128xf32, #tpu.memory_space<vmem>>, %arg3: memref<16x256xf32, #tpu.memory_space<vmem>>) attributes {dimension_semantics = [#tpu.dimension_semantics<parallel>], iteration_bounds = array<i64: 1>, scalar_prefetch = 0 : i64, scratch_operands = 0 : i64, tpu.core_type = #tpu.core_type<tc>, window_params = [{pipeline_mode = #tpu.pipeline_mode<synchronous>, transform_indices = @transform_0, window_bounds = array<i64: 16, 1>}, {pipeline_mode = #tpu.pipeline_mode<synchronous>, transform_indices = @transform_1, window_bounds = array<i64: 1, 128>}, {transform_indices = @transform_2, window_bounds = array<i64: 16, 256>}]} {
    %c16_i32 = arith.constant 16 : i32
    %0 = arith.muli %arg0, %c16_i32 : i32
    %1 = tpu.assume_multiple %0, 16 : i32
    %2 = arith.index_cast %1 : i32 to index
    %c0 = arith.constant 0 : index
    %3 = vector.load %arg1[%2, %c0] : memref<16x1xf32, #tpu.memory_space<vmem>>, vector<16x1xf32>
    %c0_0 = arith.constant 0 : index
    %c0_1 = arith.constant 0 : index
    %4 = vector.load %arg2[%c0_0, %c0_1] : memref<1x128xf32, #tpu.memory_space<vmem>>, vector<1x128xf32>
    %cst = arith.constant 6.28318548 : f32
    %5 = vector.broadcast %cst : f32 to vector<1x128xf32>
    %6 = arith.mulf %4, %5 : vector<1x128xf32>
    %7 = vector.broadcast %3 : vector<16x1xf32> to vector<16x128xf32>
    %8 = vector.broadcast %6 : vector<1x128xf32> to vector<16x128xf32>
    %9 = arith.mulf %7, %8 : vector<16x128xf32>
    %10 = math.sin %9 : vector<16x128xf32>
    %c0_2 = arith.constant 0 : index
    %c0_3 = arith.constant 0 : index
    %11 = vector.load %arg3[%c0_2, %c0_3] : memref<16x256xf32, #tpu.memory_space<vmem>>, vector<16x128xf32>
    tpu.vector_store %arg3[%c0_2, %c0_3], %10 {strides = array<i32>} : memref<16x256xf32, #tpu.memory_space<vmem>>, vector<16x128xf32>,
    %12 = math.cos %9 : vector<16x128xf32>
    %c0_4 = arith.constant 0 : index
    %c128 = arith.constant 128 : index
    %13 = vector.load %arg3[%c0_4, %c128] : memref<16x256xf32, #tpu.memory_space<vmem>>, vector<16x128xf32>
    tpu.vector_store %arg3[%c0_4, %c128], %12 {strides = array<i32>} : memref<16x256xf32, #tpu.memory_space<vmem>>, vector<16x128xf32>,
    return
  }
  func.func @transform_0(%arg0: i32) -> (i32, i32) {
    %c0_i32 = arith.constant 0 : i32
    %c0_i32_0 = arith.constant 0 : i32
    %c0_i32_1 = arith.constant 0 : i32
    return %c0_i32, %c0_i32_0 : i32, i32
  }
  func.func @transform_1(%arg0: i32) -> (i32, i32) {
    %c0_i32 = arith.constant 0 : i32
    %c0_i32_0 = arith.constant 0 : i32
    %c0_i32_1 = arith.constant 0 : i32
    return %c0_i32, %c0_i32_0 : i32, i32
  }
  func.func @transform_2(%arg0: i32) -> (i32, i32) {
    %c0_i32 = arith.constant 0 : i32
    %c0_i32_0 = arith.constant 0 : i32
    return %arg0, %c0_i32 : i32, i32
  }
}

</mosaic_0001>

<bundles_post_ra>
// kernel: tpu_custom_call.1
= control target key start
LH: loop header
LB: loop body
LE: loop exit
PB: predicated region body
PF: predicated region fallthrough
CT: control target
= control target key end

     0   :  { %v535_v1 = vmov 0   ;;  %s632_s0 = inlined_call_operand.vmem [shape: f32[16,1], index: 0, kind: input, shape index: {}]   ;;  %s633_s1 = inlined_call_operand.vmem [shape: f32[1,128], index: 1, kind: input, shape index: {}]   ;;  %s634_s2 = inlined_call_operand.hbm [shape: f32[16,256], index: 2, kind: output, shape index: {}]  }
   0x1   :  { %v14_v0 = vld [vmem:[%s632_s0] sm:$0xff]  ;;  %504 = vset.pattern.permute.xlu0 %v535_v1  ;;  %v15_v2 = vld [vmem:[%s632_s0 + $0x8] sm:$0xff] }
   0x2   :  { %20 = vperm.xlu0 %504, %v14_v0  }
   0x3   :  { %7 = vsyncpa [#allocation3], 0  ;;  %v29_v3 = vlaneseq  ;;  %v16_v5 = vld [vmem:[%s633_s1] sm:$0x1]  ;;  %v536_v29 = vmov 683565275  }
   0x4   :  { %v17_v6 = vmul.f32 6.2831855, %v16_v5  ;;  %v537_v33 = vmov 2475754826   ;;  %v538_v35 = vmov 2131351028  }
   0x5   :  { %v30_v4 = vshrl.u32 %v29_v3, 7  ;;  %v539_v37 = vmov 2102212464   ;;  %v540_v39 = vmov 920167782   ;;  %s542_s0 = smov [#allocation2]  }
   0x6   :  { %25 = vperm.xlu0 %504, %v15_v2   ;;  %v541_v46 = vmov 1326507024   ;;  %s459_s1 = sshll.u32 %s542_s0, 4  ;;  %s460_s1 = int_to_ptr.vmem [resolvable:$true] %s459_s1 }
   0x7   :  { %v31_v7 = vsub.s32 0, %v30_v4  ;;  %s513_s15 = scalar_lea.vmem %s460_s1, 512  ;;  %p518_p1 = scmp.lt.s32.totalorder %s460_s1, %s460_s1 }
   0x8   :  { %p514_p0 = scmp.ne.s32.totalorder %s460_s1, %s513_s15  ;;  %p519_p2 = scmp.lt.s32.totalorder %s513_s15, %s513_s15 }
   0x9   :  { %v32_v8 = vrot.slane %v17_v6, %v31_v7 }
   0xa   :  { %p520_p3 = por %p519_p2, %p518_p1 }
   0xc   :  { %p521_p4 = pnand %p520_p3, %p514_p0 }
  0x7d   :  { %v21_v9 = vpop.permute.xlu0 %20 }
  0x7e   :  { %v569_v10 = vmul.f32 %v32_v8, %v21_v9 }
  0x80   :  { %v36_v11 = vand.u32 2147483647, %v569_v10  ;;  %v39_v12 = vand.u32 2139095040, %v569_v10  ;;  %vm38_vm14 = vcmp.lt.s32.totalorder %v569_v10, 0 }
  0x81   :  { %v26_v13 = vpop.permute.xlu0 %25 }
  0x82   :  { %v40_v14 = vshrl.u32 %v39_v12, 23  ;;  %v573_v15 = vmul.f32 %v32_v8, %v26_v13  ;;  %v43_v16 = vand.u32 8388607, %v36_v11  ;;  %vm37_vm15 = vcmp.le.f32.partialorder %v36_v11, 0.7853982 }
  0x84   :  { %v470_v17 = vadd.s32 4294967169, %v40_v14  ;;  %v143_v18 = vand.u32 2139095040, %v573_v15  ;;  %v44_v20 = vor.u32 8388608, %v43_v16  ;;  %v140_v22 = vand.u32 2147483647, %v573_v15 }
  0x86   :  { %v46_v19 = vadd.s32 1, %v470_v17  ;;  %v144_v21 = vshrl.u32 %v143_v18, 23  ;;  %v579_v27 = vshll.u32 %v44_v20, 8  ;;  %v147_v31 = vand.u32 8388607, %v140_v22 }
  0x88   :  { %vm47_vm0 = vcmp.gt.s32.totalorder %v46_v19, 0  ;;  %v474_v24 = vadd.s32 4294967169, %v144_v21  ;;  %v148_v61 = vor.u32 8388608, %v147_v31 }
  0x89   :  { %v48_v23 = vsel %vm47_vm0, %v46_v19, 0  ;;  %vm142_vm0 = vcmp.lt.s32.totalorder %v573_v15, 0 }
  0x8a   :  { %v49_v25 = vshrl.u32 %v48_v23, 5  ;;  %v50_v26 = vand.u32 31, %v48_v23  ;;  %v150_v32 = vadd.s32 1, %v474_v24  ;;  %v188_v12 = vshll.u32 %v148_v61, 8 }
  0x8c   :  { %v51_v28 = vsub.s32 32, %v50_v26  ;;  %v53_v30 = vshll.u32 %v536_v29, %v50_v26  ;;  %v56_v34 = vshll.u32 %v537_v33, %v50_v26  ;;  %v59_v36 = vshll.u32 %v538_v35, %v50_v26 }
  0x8d   :  { %v62_v38 = vshll.u32 %v539_v37, %v50_v26  ;;  %v65_v40 = vshll.u32 %v540_v39, %v50_v26  ;;  %vm68_vm1 = vcmp.lt.s32.totalorder %v49_v25, 1  ;;  %vm70_vm2 = vcmp.lt.s32.totalorder %v49_v25, 3 }
  0x8e   :  { %v54_v41 = vshrl.u32 %v537_v33, %v51_v28  ;;  %v57_v42 = vshrl.u32 %v538_v35, %v51_v28  ;;  %v60_v43 = vshrl.u32 %v539_v37, %v51_v28  ;;  %v52_v44 = vshrl.u32 %v536_v29, %v51_v28 }
  0x8f   :  { %v63_v45 = vshrl.u32 %v540_v39, %v51_v28  ;;  %v66_v47 = vshrl.u32 %v541_v46, %v51_v28  ;;  %vm151_vm3 = vcmp.gt.s32.totalorder %v150_v32, 0  ;;  %vm71_vm4 = vcmp.lt.s32.totalorder %v49_v25, 4 }
  0x90   :  { %v55_v48 = vor.u32 %v54_v41, %v53_v30  ;;  %v58_v49 = vor.u32 %v57_v42, %v56_v34  ;;  %v61_v50 = vor.u32 %v60_v43, %v59_v36  ;;  %v152_v53 = vsel %vm151_vm3, %v150_v32, 0 }
  0x91   :  { %v64_v51 = vor.u32 %v63_v45, %v62_v38  ;;  %v67_v52 = vor.u32 %v66_v47, %v65_v40  ;;  %vm69_vm5 = vcmp.lt.s32.totalorder %v49_v25, 2  ;;  %v154_v0 = vand.u32 31, %v152_v53 }
  0x92   :  { %v72_v54 = vsel %vm68_vm1, %v52_v44, %v55_v48  ;;  %v73_v55 = vsel %vm71_vm4, %v61_v50, 2102212464  ;;  %v76_v56 = vsel %vm68_vm1, %v55_v48, %v58_v49  ;;  %v80_v57 = vsel %vm68_vm1, %v58_v49, %v61_v50 }
  0x93   :  { %v74_v58 = vsel %vm70_vm2, %v58_v49, %v73_v55  ;;  %v77_v59 = vsel %vm71_vm4, %v64_v51, 920167782  ;;  %v81_v60 = vsel %vm71_vm4, %v67_v52, 1326507024  ;;  %v153_v8 = vshrl.u32 %v152_v53, 5 }
  0x94   :  { %v78_v62 = vsel %vm70_vm2, %v61_v50, %v77_v59  ;;  %v82_v63 = vsel %vm70_vm2, %v64_v51, %v81_v60  ;;  %v75_v1 = vsel %vm69_vm5, %v72_v54, %v74_v58  ;;  %v155_v9 = vsub.s32 32, %v154_v0 }
  0x95   :  { %v79_v2 = vsel %vm69_vm5, %v76_v56, %v78_v62  ;;  %v83_v3 = vsel %vm69_vm5, %v80_v57, %v82_v63  ;;  %v91_v13 = vmul.u32 %v579_v27, %v75_v1  ;;  %v157_v14 = vshll.u32 %v536_v29, %v154_v0 }
  0x96   :  { %v592_v4 = vmul.u32.u64.low %v579_v27, %v83_v3  ;;  %v593_v5 = vmul.u32.u64.high %v579_v27, %v83_v3, %v592_v4  ;;  %v596_v6 = vmul.u32.u64.low %v579_v27, %v79_v2  ;;  %v597_v7 = vmul.u32.u64.high %v579_v27, %v79_v2, %v596_v6 }
  0x97   :  { %v160_v16 = vshll.u32 %v537_v33, %v154_v0  ;;  %v163_v17 = vshll.u32 %v538_v35, %v154_v0  ;;  %v158_v18 = vshrl.u32 %v537_v33, %v155_v9  ;;  %v161_v19 = vshrl.u32 %v538_v35, %v155_v9 }
  0x98   :  { %v164_v20 = vshrl.u32 %v539_v37, %v155_v9  ;;  %v166_v21 = vshll.u32 %v539_v37, %v154_v0  ;;  %vm93_vm6 = vc.u32 %v593_v5, %v596_v6  ;;  %v94_v23 = vadd.s32 1, %v597_v7 }
  0x99   :  { %v167_v24 = vshrl.u32 %v540_v39, %v155_v9  ;;  %v169_v25 = vshll.u32 %v540_v39, %v154_v0  ;;  %v159_v26 = vor.u32 %v158_v18, %v157_v14  ;;  %v162_v28 = vor.u32 %v161_v19, %v160_v16 }
  0x9a   :  { %v165_v30 = vor.u32 %v164_v20, %v163_v17  ;;  %v170_v31 = vshrl.u32 %v541_v46, %v155_v9  ;;  %v95_v27 = vsel %vm93_vm6, %v94_v23, %v597_v7  ;;  %vm172_vm7 = vcmp.lt.s32.totalorder %v153_v8, 1 }
  0x9b   :  { %v168_v32 = vor.u32 %v167_v24, %v166_v21  ;;  %vm175_vm8 = vcmp.lt.s32.totalorder %v153_v8, 4  ;;  %v96_v33 = vadd.s32 %v95_v27, %v91_v13  ;;  %vm174_vm9 = vcmp.lt.s32.totalorder %v153_v8, 3 }
  0x9c   :  { %v171_v34 = vor.u32 %v170_v31, %v169_v25  ;;  %v177_v35 = vsel %vm175_vm8, %v165_v30, 2102212464  ;;  %v156_v36 = vshrl.u32 %v536_v29, %v155_v9  ;;  %v180_v37 = vsel %vm172_vm7, %v159_v26, %v162_v28 }
  0x9d   :  { %v181_v38 = vsel %vm175_vm8, %v168_v32, 920167782  ;;  %v184_v40 = vsel %vm172_vm7, %v162_v28, %v165_v30  ;;  %v97_v41 = vadd.s32 536870912, %v96_v33  ;;  %vm173_vm10 = vcmp.lt.s32.totalorder %v153_v8, 2 }
  0x9e   :  { %v182_v39 = vsel %vm174_vm9, %v165_v30, %v181_v38  ;;  %v185_v42 = vsel %vm175_vm8, %v171_v34, 1326507024  ;;  %v176_v43 = vsel %vm172_vm7, %v156_v36, %v159_v26  ;;  %v178_v44 = vsel %vm174_vm9, %v162_v28, %v177_v35 }
  0x9f   :  { %v183_v45 = vsel %vm173_vm10, %v180_v37, %v182_v39  ;;  %v186_v46 = vsel %vm174_vm9, %v168_v32, %v185_v42  ;;  %v98_v47 = vshrl.u32 %v97_v41, 30  ;;  %v179_v53 = vsel %vm173_vm10, %v176_v43, %v178_v44 }
  0xa0   :  { %v187_v48 = vsel %vm173_vm10, %v184_v40, %v186_v46  ;;  %v607_v49 = vmul.u32.u64.low %v188_v12, %v183_v45  ;;  %v608_v50 = vmul.u32.u64.high %v188_v12, %v183_v45, %v607_v49  ;;  %v195_v56 = vmul.u32 %v188_v12, %v179_v53 }
  0xa1   :  { %v610_v51 = vmul.u32.u64.low %v188_v12, %v187_v48  ;;  %v611_v52 = vmul.u32.u64.high %v188_v12, %v187_v48, %v610_v51  ;;  %v99_v29 = vshll.u32 %v98_v47, 30  ;;  %v92_v4 = vadd.s32 %v596_v6, %v593_v5 }
  0xa2   :  { %v198_v55 = vadd.s32 1, %v608_v50  ;;  %v122_v31 = vsub.s32 4, %v98_v47  ;;  %vm141_vm1 = vcmp.le.f32.partialorder %v140_v22, 0.7853982  ;;  %vm128_vm8 = vweird.f32 %v569_v10 }
  0xa3   :  { %v100_v54 = vsub.s32 %v96_v33, %v99_v29  ;;  %vm197_vm11 = vc.u32 %v611_v52, %v607_v49  ;;  %v196_v28 = vadd.s32 %v607_v49, %v611_v52 }
  0xa4   :  { %v199_v58 = vsel %vm197_vm11, %v198_v55, %v608_v50  ;;  %v123_v38 = vsel %vm38_vm14, %v122_v31, %v98_v47 }
  0xa5   :  { %v102_v57 = vsub.s32 0, %v100_v54  ;;  %v200_v59 = vadd.s32 %v199_v58, %v195_v56  ;;  %v125_v42 = vsel %vm37_vm15, 0, %v123_v38 }
  0xa6   :  { %v129_v44 = vadd.s32 3, %v125_v42  ;;  %v339_v50 = vand.u32 3, %v125_v42 }
  0xa7   :  { %v471_v60 = vmin.u32 %v102_v57, %v100_v54  ;;  %v201_v61 = vadd.s32 536870912, %v200_v59 }
  0xa8   :  { %v130_v49 = vand.u32 3, %v129_v44  ;;  %vm344_vm3 = vcmp.eq.s32.totalorder %v339_v50, 2  ;;  %vm341_vm5 = vcmp.eq.s32.totalorder %v339_v50, 0  ;;  %vm340_vm7 = vcmp.lt.s32.totalorder %v339_v50, 2 }
  0xa9   :  { %v104_v62 = vclz %v471_v60  ;;  %v202_v63 = vshrl.u32 %v201_v61, 30 }
  0xaa   :  { %vm135_vm2 = vcmp.eq.s32.totalorder %v130_v49, 2  ;;  %vm132_vm4 = vcmp.eq.s32.totalorder %v130_v49, 0  ;;  %vm131_vm6 = vcmp.lt.s32.totalorder %v130_v49, 2 }
  0xab   :  { %v472_v0 = vadd.s32 4294967294, %v104_v62  ;;  %v203_v1 = vshll.u32 %v202_v63, 30  ;;  %v226_v46 = vsub.s32 4, %v202_v63 }
  0xad   :  { %vm473_vm12 = vcmp.lt.s32.totalorder %v472_v0, 0  ;;  %v204_v3 = vsub.s32 %v200_v59, %v203_v1  ;;  %v227_v47 = vsel %vm142_vm0, %v226_v46, %v202_v63 }
  0xae   :  { %v107_v2 = vsel %vm473_vm12, 0, %v472_v0 }
  0xaf   :  { %v108_v7 = vsub.s32 32, %v107_v2  ;;  %v112_v8 = vsub.s32 4294967266, %v107_v2  ;;  %v206_v9 = vsub.s32 0, %v204_v3  ;;  %v109_v12 = vshll.u32 %v100_v54, %v107_v2 }
  0xb0   :  { %v229_v54 = vsel %vm141_vm1, 0, %v227_v47 }
  0xb1   :  { %v110_v13 = vshrl.u32 %v92_v4, %v108_v7  ;;  %v113_v14 = vadd.s32 127, %v112_v8  ;;  %v475_v16 = vmin.u32 %v206_v9, %v204_v3  ;;  %v233_v60 = vadd.s32 3, %v229_v54 }
  0xb2   :  { %v442_v0 = vand.u32 3, %v229_v54 }
  0xb3   :  { %v111_v17 = vor.u32 %v110_v13, %v109_v12  ;;  %v114_v18 = vshll.u32 %v113_v14, 23  ;;  %v208_v19 = vclz %v475_v16  ;;  %v234_v63 = vand.u32 3, %v233_v60 }
  0xb4   :  { %vm447_vm10 = vcmp.eq.s32.totalorder %v442_v0, 2  ;;  %vm444_vm12 = vcmp.eq.s32.totalorder %v442_v0, 0 }
  0xb5   :  { %v115_v20 = vor.u32 4788187, %v114_v18  ;;  %v476_v21 = vadd.s32 4294967294, %v208_v19  ;;  %v118_v24 = vcvt.s32.f32 %v111_v17  ;;  %vm239_vm9 = vcmp.eq.s32.totalorder %v234_v63, 2 }
  0xb6   :  { %vm236_vm11 = vcmp.eq.s32.totalorder %v234_v63, 0 }
  0xb7   :  { %v116_v23 = vand.u32 2147483647, %v115_v20  ;;  %vm477_vm13 = vcmp.lt.s32.totalorder %v476_v21, 0 }
  0xb8   :  { %v211_v26 = vsel %vm477_vm13, 0, %v476_v21  ;;  %vm235_vm13 = vcmp.lt.s32.totalorder %v234_v63, 2 }
  0xb9   :  { %v119_v25 = vmul.f32 %v118_v24, %v116_v23  ;;  %v212_v5 = vsub.s32 32, %v211_v26  ;;  %v216_v6 = vsub.s32 4294967266, %v211_v26  ;;  %v213_v27 = vshll.u32 %v204_v3, %v211_v26 }
  0xbb   :  { %v120_v30 = vxor.u32 2147483648, %v119_v25  ;;  %v214_v32 = vshrl.u32 %v196_v28, %v212_v5  ;;  %v217_v33 = vadd.s32 127, %v216_v6 }
  0xbd   :  { %v121_v34 = vsel %vm38_vm14, %v120_v30, %v119_v25  ;;  %v215_v36 = vor.u32 %v214_v32, %v213_v27  ;;  %v218_v37 = vshll.u32 %v217_v33, 23  ;;  %vm443_vm14 = vcmp.lt.s32.totalorder %v442_v0, 2 }
  0xbe   :  { %v124_v35 = vsel %vm37_vm15, %v569_v10, %v121_v34  ;;  %vm232_vm15 = vweird.f32 %v573_v15 }
  0xbf   :  { %505 = vcosq.f32 %v124_v35  ;;  %v219_v40 = vor.u32 4788187, %v218_v37  ;;  %v222_v39 = vcvt.s32.f32 %v215_v36 }
  0xc0   :  { %507 = vsinq.f32 %v124_v35 }
  0xc1   :  { %v220_v41 = vand.u32 2147483647, %v219_v40 }
  0xc3   :  { %v223_v43 = vmul.f32 %v222_v39, %v220_v41 }
  0xc5   :  { %v224_v45 = vxor.u32 2147483648, %v223_v43 }
  0xc7   :  { %v225_v11 = vsel %vm142_vm0, %v224_v45, %v223_v43 }
  0xc8   :  { %v228_v48 = vsel %vm141_vm1, %v573_v15, %v225_v11 }
  0xc9   :  { %509 = vcosq.f32 %v228_v48 }
  0xca   :  { %511 = vsinq.f32 %v228_v48 }
  0xcc   :  { %v506_v51 = vpop.eup %505 }
  0xcd   :  { %v508_v52 = vpop.eup %507  ;;  %v136_v29 = vxor.u32 2147483648, %v506_v51 }
  0xce   :  { %v133_v53 = vxor.u32 2147483648, %v508_v52 }
  0xcf   :  { %v137_v55 = vsel %vm135_vm2, %v136_v29, %v508_v52  ;;  %v346_v56 = vsel %vm344_vm3, %v136_v29, %v508_v52 }
  0xd0   :  { %v134_v22 = vsel %vm132_vm4, %v506_v51, %v133_v53  ;;  %v343_v57 = vsel %vm341_vm5, %v506_v51, %v133_v53 }
  0xd1   :  { %v138_v58 = vsel %vm131_vm6, %v134_v22, %v137_v55  ;;  %v347_v59 = vsel %vm340_vm7, %v343_v57, %v346_v56 }
  0xd2   :  { %v139_v61 = vsel %vm128_vm8, nan, %v138_v58  ;;  %v348_v62 = vsel %vm128_vm8, nan, %v347_v59 }
  0xd3   :  { %244 = vst [vmem:[#allocation2] sm:$0xff] %v139_v61  ;;  %452 = vst [vmem:[#allocation2 + $0x8] sm:$0xff] %v348_v62 }
  0xd6   :  { %v510_v1 = vpop.eup %509 }
  0xd7   :  { %v512_v2 = vpop.eup %511  ;;  %v240_v3 = vxor.u32 2147483648, %v510_v1 }
  0xd8   :  { %v237_v4 = vxor.u32 2147483648, %v512_v2 }
  0xd9   :  { %v241_v7 = vsel %vm239_vm9, %v240_v3, %v512_v2  ;;  %v449_v10 = vsel %vm447_vm10, %v240_v3, %v512_v2 }
  0xda   :  { %v238_v8 = vsel %vm236_vm11, %v510_v1, %v237_v4  ;;  %v446_v9 = vsel %vm444_vm12, %v510_v1, %v237_v4 }
  0xdb   :  { %v242_v12 = vsel %vm235_vm13, %v238_v8, %v241_v7  ;;  %v450_v13 = vsel %vm443_vm14, %v446_v9, %v449_v10 }
  0xdc   :  { %v243_v14 = vsel %vm232_vm15, nan, %v242_v12  ;;  %v451_v16 = vsel %vm232_vm15, nan, %v450_v13 }
  0xdd   :  { %245 = vst [vmem:[#allocation2 + $0x10] sm:$0xff] %v243_v14  ;;  %453 = vst [vmem:[#allocation2 + $0x18] sm:$0xff] %v451_v16 }
  0xde   :  { %524 = shalt.err (!%p521_p4)
}
  0xdf   :  { %s543_s16 = smov 256   ;;  %s544_s17 = smov 16  }
  0xe0   :  { %465 = dma.vmem_to_hbm [thread:$0]  %s460_s1, 512, %s634_s2, [#allocation3], %s543_s16, %s543_s16, %s544_s17  }
  0xe1   :  { %533 = dma.done.wait [#allocation3], 512  }
  0xe2   :  { %534 = vsyncadd [#allocation3], 4294966784 }
  0xe3   :  { %469 = vsyncpa [#allocation3], 1 }

</bundles_post_ra>
